<compile_context>
chip_gen: v5e
topology: v5e:2x2
jax: 0.10.0
libtpu: 0.0.40
codegen_flags: <defaults>
</compile_context>

<pallas_src>
import functools
import math

import jax
import jax.numpy as jnp
import numpy as np
from jax.experimental import pallas as pl
from jax.experimental.pallas import tpu as pltpu

_INV_SQRT2 = 1.0 / math.sqrt(2.0)

# Lane-dense tiling parameters (see perf notes above).
_LANES = 1024        # last-dim width: large multiple of 128 -> unmasked vst
_BLOCK_ROWS = 512    # 512*1024*4B = 2 MiB per stream tile


def _erf(x):
    """Polynomial erf (Abramowitz & Stegun 7.1.26, |abs err| <= 1.5e-7).

    Built only from mul/add/div/exp/compare/select so it lowers cleanly on the
    TPU VPU/EUP without depending on a lax.erf lowering inside Mosaic.
    """
    a1 = 0.254829592
    a2 = -0.284496736
    a3 = 1.421413741
    a4 = -1.453152027
    a5 = 1.061405429
    p = 0.3275911
    ax = jnp.abs(x)
    t = 1.0 / (1.0 + p * ax)
    poly = t * (a1 + t * (a2 + t * (a3 + t * (a4 + t * a5))))
    y = 1.0 - poly * jnp.exp(-ax * ax)
    return jnp.where(x >= 0.0, y, -y)


def _norm_cdf(x):
    return 0.5 * (1.0 + _erf(x * _INV_SQRT2))


def _curran_kernel(*refs, option_type: str, vol_adj_factor: float,
                   is_scalar: tuple):
    """Elementwise Curran-approximation pricing on one (block_rows, lanes) tile.

    refs = (spot, strike, expiry, vol, rate, out).  Inputs flagged in
    `is_scalar` are (1,1) SMEM refs; the rest are VMEM tiles.
    """
    in_refs = refs[:5]
    out_ref = refs[5]

    def read(i):
        if is_scalar[i]:
            return in_refs[i][0, 0]          # scalar from SMEM, broadcasts below
        return in_refs[i][...]               # full VMEM tile

    spot, strike, expiry, vol, rate = (read(i) for i in range(5))

    adj_vol = vol * vol_adj_factor
    sig_sqrt_t = adj_vol * jnp.sqrt(expiry)                    # hoisted once
    d1 = (jnp.log(spot / strike)
          + (rate + 0.5 * adj_vol * adj_vol) * expiry) / sig_sqrt_t
    d2 = d1 - sig_sqrt_t
    disc = jnp.exp(-rate * expiry)                             # discount factored once

    if option_type == 'call':
        price = disc * (spot * _norm_cdf(d1) - strike * _norm_cdf(d2))
    else:  # 'put'
        price = disc * (strike * _norm_cdf(-d2) - spot * _norm_cdf(-d1))

    # broadcast_to is a no-op when price already has tile shape; it only matters
    # in the degenerate all-scalar-inputs case.
    out_ref[...] = jnp.broadcast_to(price, out_ref.shape).astype(out_ref.dtype)


@functools.partial(jax.jit, static_argnames=('num_steps', 'option_type'))
def curran_asian_price(spot, strike, expiry, volatility, rate, *,
                       num_steps: int, option_type: str):
    inputs = tuple(jnp.asarray(x) for x in (spot, strike, expiry, volatility, rate))
    out_shape = jnp.broadcast_shapes(*(x.shape for x in inputs))
    out_dtype = jnp.result_type(*inputs)
    n = math.prod(out_shape) if out_shape else 1

    # Size-1 params go to SMEM (broadcast in-kernel); arrays are tiled lane-dense.
    is_scalar = tuple(x.size == 1 for x in inputs)

    # Lane-dense layout: flatten -> (rows_padded, lanes), last dim multiple of 128.
    lanes = _LANES if n >= _LANES else 128
    rows = pl.cdiv(n, lanes)
    if rows <= _BLOCK_ROWS:
        block_rows = rows            # full second-to-last dim -> no (8,128) issue
        grid_rows = 1
    else:
        block_rows = _BLOCK_ROWS     # divisible by 8
        grid_rows = pl.cdiv(rows, block_rows)
    rows_padded = grid_rows * block_rows
    pad = rows_padded * lanes - n

    # Benign fills keep the padded tail finite; it is sliced off below.
    fills = (1.0, 1.0, 1.0, 1.0, 0.0)   # spot, strike, expiry, vol, rate

    def prep_array(x, fill):
        x = jnp.broadcast_to(x, out_shape).reshape(-1).astype(jnp.float32)
        if pad:
            x = jnp.pad(x, (0, pad), constant_values=fill)
        return x.reshape(rows_padded, lanes)

    def prep_scalar(x):
        return x.reshape(1, 1).astype(jnp.float32)

    tile_spec = pl.BlockSpec((block_rows, lanes), lambda i: (i, 0))
    smem_spec = pl.BlockSpec(memory_space=pltpu.MemorySpace.SMEM)

    args = []
    in_specs = []
    for x, fill, sc in zip(inputs, fills, is_scalar):
        if sc:
            args.append(prep_scalar(x))
            in_specs.append(smem_spec)
        else:
            args.append(prep_array(x, fill))
            in_specs.append(tile_spec)

    vol_adj_factor = math.sqrt((num_steps + 1) / (6.0 * num_steps))
    kernel = functools.partial(_curran_kernel, option_type=option_type,
                               vol_adj_factor=vol_adj_factor, is_scalar=is_scalar)

    out = pl.pallas_call(
        kernel,
        out_shape=jax.ShapeDtypeStruct((rows_padded, lanes), jnp.float32),
        grid_spec=pltpu.PrefetchScalarGridSpec(
            num_scalar_prefetch=0,
            grid=(grid_rows,),
            in_specs=in_specs,
            out_specs=tile_spec,
        ),
        compiler_params=pltpu.CompilerParams(
            dimension_semantics=("parallel",),          # v7x: 2 TCs split the grid
            vmem_limit_bytes=32 * 1024 * 1024,          # <=24 MiB working set fits
        ),
    )(*args)

    return out.reshape(-1)[:n].reshape(out_shape).astype(out_dtype)


class CurranAsianOption:
    """Curran-approximation Asian option priced with a Pallas TPU kernel."""

    def __init__(self, option_type: str, average_type: str = 'arithmetic',
                 validate: bool = False):
        if option_type not in ('call', 'put'):
            raise ValueError("Option type must be either 'call' or 'put'.")
        if average_type != 'arithmetic':
            # TODO(synk): geometric branch depends on external black_scholes_merton; not ported.
            raise NotImplementedError("Only average_type='arithmetic' is implemented.")
        self.option_type = option_type
        self.average_type = average_type
        # Host-side validation forces a device sync and breaks under jit; kept off
        # the hot path (opt-in only), matching the original ValidationMixin intent.
        self.validate = validate

    def __call__(self, spot, strike, expiry, volatility, rate, num_steps: int):
        if self.validate:
            if float(jnp.min(volatility)) <= 0.0 or float(jnp.min(expiry)) <= 0.0:
                raise ValueError('Volatility and expiry must be positive.')
        return curran_asian_price(spot, strike, expiry, volatility, rate,
                                  num_steps=int(num_steps),
                                  option_type=self.option_type)


def _reference_np(spot, strike, expiry, vol, rate, num_steps, option_type):
    """Float64 numpy reference of the same formula (exact erf via math.erf)."""
    spot = np.asarray(spot, dtype=np.float64)
    strike = np.asarray(strike, dtype=np.float64)
    expiry = np.asarray(expiry, dtype=np.float64)
    vol = np.asarray(vol, dtype=np.float64)
    rate = np.asarray(rate, dtype=np.float64)
    erf = np.vectorize(math.erf)
    cdf = lambda x: 0.5 * (1.0 + erf(x / math.sqrt(2.0)))
    adj = vol * math.sqrt((num_steps + 1) / (6.0 * num_steps))
    sqrt_t = np.sqrt(expiry)
    d1 = (np.log(spot / strike) + (rate + 0.5 * adj ** 2) * expiry) / (adj * sqrt_t)
    d2 = d1 - adj * sqrt_t
    disc = np.exp(-rate * expiry)
    if option_type == 'call':
        return disc * (spot * cdf(d1) - strike * cdf(d2))
    return disc * (strike * cdf(-d2) - spot * cdf(-d1))


if __name__ == "__main__":
    key = jax.random.PRNGKey(0)
    k1, k2, k3, k4, k5 = jax.random.split(key, 5)

    B, N = 8, 128  # small elementwise parameter batch
    spot = 100.0 + 10.0 * jax.random.normal(k1, (B, N), dtype=jnp.float32)
    strike = 100.0 + 5.0 * jax.random.normal(k2, (B, N), dtype=jnp.float32)
    expiry = 0.5 + jax.random.uniform(k3, (B, N), dtype=jnp.float32)             # (0.5, 1.5)
    volatility = 0.15 + 0.2 * jax.random.uniform(k4, (B, N), dtype=jnp.float32)  # (0.15, 0.35)
    rate = 0.01 + 0.04 * jax.random.uniform(k5, (B, N), dtype=jnp.float32)       # (0.01, 0.05)
    num_steps = 12

    # f32 kernel vs f64 reference: allow f32 cancellation / polynomial-erf error.
    RTOL, ATOL = 1e-4, 1e-3

    call_pricer = CurranAsianOption('call')
    call_price = jax.block_until_ready(
        call_pricer(spot, strike, expiry, volatility, rate, num_steps))
    call_ref = _reference_np(spot, strike, expiry, volatility, rate, num_steps, 'call')
    assert call_price.shape == (B, N) and call_price.dtype == jnp.float32
    assert np.allclose(np.asarray(call_price), call_ref, rtol=RTOL, atol=ATOL)

    put_pricer = CurranAsianOption('put')
    put_price = jax.block_until_ready(
        put_pricer(spot, strike, expiry, volatility, rate, num_steps))
    put_ref = _reference_np(spot, strike, expiry, volatility, rate, num_steps, 'put')
    assert np.allclose(np.asarray(put_price), put_ref, rtol=RTOL, atol=ATOL)

    # Mixed array/scalar inputs on a non-tile-aligned shape: exercises the
    # pad/flatten path for the spot array and the SMEM scalar-broadcast path
    # for strike/expiry/vol/rate (the cheap, common production case).
    odd_shape = (5, 37)
    spot2 = 95.0 + 10.0 * jax.random.normal(k1, odd_shape, dtype=jnp.float32)
    strike2 = jnp.float32(100.0)
    expiry2 = jnp.float32(1.0)
    vol2 = jnp.float32(0.25)
    rate2 = jnp.float32(0.03)
    odd_price = jax.block_until_ready(
        call_pricer(spot2, strike2, expiry2, vol2, rate2, num_steps))
    odd_ref = _reference_np(spot2, float(strike2), float(expiry2), float(vol2),
                            float(rate2), num_steps, 'call')
    assert odd_price.shape == odd_shape
    assert np.allclose(np.asarray(odd_price), odd_ref, rtol=RTOL, atol=ATOL)

    print("KERNEL_OK")
</pallas_src>

<mosaic_0001>
module attributes {stable_mosaic.version = 11 : i64} {
  func.func @_curran_kernel(%arg0: i32, %arg1: memref<1x1024xf32, #tpu.memory_space<vmem>>, %arg2: memref<1x1024xf32, #tpu.memory_space<vmem>>, %arg3: memref<1x1024xf32, #tpu.memory_space<vmem>>, %arg4: memref<1x1024xf32, #tpu.memory_space<vmem>>, %arg5: memref<1x1024xf32, #tpu.memory_space<vmem>>, %arg6: memref<1x1024xf32, #tpu.memory_space<vmem>>) attributes {dimension_semantics = [#tpu.dimension_semantics<parallel>], iteration_bounds = array<i64: 1>, scalar_prefetch = 0 : i64, scratch_operands = 0 : i64, tpu.core_type = #tpu.core_type<tc>, window_params = [{transform_indices = @transform_0, window_bounds = array<i64: 1, 1024>}, {transform_indices = @transform_1, window_bounds = array<i64: 1, 1024>}, {transform_indices = @transform_2, window_bounds = array<i64: 1, 1024>}, {transform_indices = @transform_3, window_bounds = array<i64: 1, 1024>}, {transform_indices = @transform_4, window_bounds = array<i64: 1, 1024>}, {transform_indices = @transform_5, window_bounds = array<i64: 1, 1024>}]} {
    %c0 = arith.constant 0 : index
    %c0_0 = arith.constant 0 : index
    %0 = vector.load %arg1[%c0, %c0_0] : memref<1x1024xf32, #tpu.memory_space<vmem>>, vector<1x1024xf32>
    %c0_1 = arith.constant 0 : index
    %c0_2 = arith.constant 0 : index
    %1 = vector.load %arg2[%c0_1, %c0_2] : memref<1x1024xf32, #tpu.memory_space<vmem>>, vector<1x1024xf32>
    %c0_3 = arith.constant 0 : index
    %c0_4 = arith.constant 0 : index
    %2 = vector.load %arg3[%c0_3, %c0_4] : memref<1x1024xf32, #tpu.memory_space<vmem>>, vector<1x1024xf32>
    %c0_5 = arith.constant 0 : index
    %c0_6 = arith.constant 0 : index
    %3 = vector.load %arg4[%c0_5, %c0_6] : memref<1x1024xf32, #tpu.memory_space<vmem>>, vector<1x1024xf32>
    %c0_7 = arith.constant 0 : index
    %c0_8 = arith.constant 0 : index
    %4 = vector.load %arg5[%c0_7, %c0_8] : memref<1x1024xf32, #tpu.memory_space<vmem>>, vector<1x1024xf32>
    %cst = arith.constant 0.424918294 : f32
    %5 = vector.broadcast %cst : f32 to vector<1x1024xf32>
    %6 = arith.mulf %3, %5 : vector<1x1024xf32>
    %7 = math.sqrt %2 : vector<1x1024xf32>
    %8 = arith.mulf %6, %7 : vector<1x1024xf32>
    %9 = arith.divf %0, %1 : vector<1x1024xf32>
    %10 = math.log %9 : vector<1x1024xf32>
    %cst_9 = arith.constant 5.000000e-01 : f32
    %11 = vector.broadcast %cst_9 : f32 to vector<1x1024xf32>
    %12 = arith.mulf %11, %6 : vector<1x1024xf32>
    %13 = arith.mulf %12, %6 : vector<1x1024xf32>
    %14 = arith.addf %4, %13 : vector<1x1024xf32>
    %15 = arith.mulf %14, %2 : vector<1x1024xf32>
    %16 = arith.addf %10, %15 : vector<1x1024xf32>
    %17 = arith.divf %16, %8 : vector<1x1024xf32>
    %18 = arith.subf %17, %8 : vector<1x1024xf32>
    %cst_10 = arith.constant 0.000000e+00 : f32
    %19 = vector.broadcast %cst_10 : f32 to vector<1x1024xf32>
    %20 = arith.subf %19, %4 : vector<1x1024xf32>
    %21 = arith.mulf %20, %2 : vector<1x1024xf32>
    %22 = math.exp %21 : vector<1x1024xf32>
    %cst_11 = arith.constant 0.707106769 : f32
    %23 = vector.broadcast %cst_11 : f32 to vector<1x1024xf32>
    %24 = arith.mulf %17, %23 : vector<1x1024xf32>
    %25 = math.absf %24 : vector<1x1024xf32>
    %cst_12 = arith.constant 0.327591091 : f32
    %26 = vector.broadcast %cst_12 : f32 to vector<1x1024xf32>
    %27 = arith.mulf %26, %25 : vector<1x1024xf32>
    %cst_13 = arith.constant 1.000000e+00 : f32
    %28 = vector.broadcast %cst_13 : f32 to vector<1x1024xf32>
    %29 = arith.addf %28, %27 : vector<1x1024xf32>
    %cst_14 = arith.constant 1.000000e+00 : f32
    %30 = vector.broadcast %cst_14 : f32 to vector<1x1024xf32>
    %31 = arith.divf %30, %29 : vector<1x1024xf32>
    %cst_15 = arith.constant 1.06140542 : f32
    %32 = vector.broadcast %cst_15 : f32 to vector<1x1024xf32>
    %33 = arith.mulf %31, %32 : vector<1x1024xf32>
    %cst_16 = arith.constant -1.45315206 : f32
    %34 = vector.broadcast %cst_16 : f32 to vector<1x1024xf32>
    %35 = arith.addf %34, %33 : vector<1x1024xf32>
    %36 = arith.mulf %31, %35 : vector<1x1024xf32>
    %cst_17 = arith.constant 1.42141378 : f32
    %37 = vector.broadcast %cst_17 : f32 to vector<1x1024xf32>
    %38 = arith.addf %37, %36 : vector<1x1024xf32>
    %39 = arith.mulf %31, %38 : vector<1x1024xf32>
    %cst_18 = arith.constant -0.284496725 : f32
    %40 = vector.broadcast %cst_18 : f32 to vector<1x1024xf32>
    %41 = arith.addf %40, %39 : vector<1x1024xf32>
    %42 = arith.mulf %31, %41 : vector<1x1024xf32>
    %cst_19 = arith.constant 0.254829586 : f32
    %43 = vector.broadcast %cst_19 : f32 to vector<1x1024xf32>
    %44 = arith.addf %43, %42 : vector<1x1024xf32>
    %45 = arith.mulf %31, %44 : vector<1x1024xf32>
    %cst_20 = arith.constant 0.000000e+00 : f32
    %46 = vector.broadcast %cst_20 : f32 to vector<1x1024xf32>
    %47 = arith.subf %46, %25 : vector<1x1024xf32>
    %48 = arith.mulf %47, %25 : vector<1x1024xf32>
    %49 = math.exp %48 : vector<1x1024xf32>
    %50 = arith.mulf %45, %49 : vector<1x1024xf32>
    %cst_21 = arith.constant 1.000000e+00 : f32
    %51 = vector.broadcast %cst_21 : f32 to vector<1x1024xf32>
    %52 = arith.subf %51, %50 : vector<1x1024xf32>
    %cst_22 = arith.constant 0.000000e+00 : f32
    %53 = vector.broadcast %cst_22 : f32 to vector<1x1024xf32>
    %54 = arith.cmpf oge, %24, %53 : vector<1x1024xf32>
    %cst_23 = arith.constant 0.000000e+00 : f32
    %55 = vector.broadcast %cst_23 : f32 to vector<1x1024xf32>
    %56 = arith.subf %55, %52 : vector<1x1024xf32>
    %57 = arith.select %54, %52, %56 : vector<1x1024xi1>, vector<1x1024xf32>
    %cst_24 = arith.constant 1.000000e+00 : f32
    %58 = vector.broadcast %cst_24 : f32 to vector<1x1024xf32>
    %59 = arith.addf %58, %57 : vector<1x1024xf32>
    %cst_25 = arith.constant 5.000000e-01 : f32
    %60 = vector.broadcast %cst_25 : f32 to vector<1x1024xf32>
    %61 = arith.mulf %60, %59 : vector<1x1024xf32>
    %62 = arith.mulf %0, %61 : vector<1x1024xf32>
    %cst_26 = arith.constant 0.707106769 : f32
    %63 = vector.broadcast %cst_26 : f32 to vector<1x1024xf32>
    %64 = arith.mulf %18, %63 : vector<1x1024xf32>
    %65 = math.absf %64 : vector<1x1024xf32>
    %cst_27 = arith.constant 0.327591091 : f32
    %66 = vector.broadcast %cst_27 : f32 to vector<1x1024xf32>
    %67 = arith.mulf %66, %65 : vector<1x1024xf32>
    %cst_28 = arith.constant 1.000000e+00 : f32
    %68 = vector.broadcast %cst_28 : f32 to vector<1x1024xf32>
    %69 = arith.addf %68, %67 : vector<1x1024xf32>
    %cst_29 = arith.constant 1.000000e+00 : f32
    %70 = vector.broadcast %cst_29 : f32 to vector<1x1024xf32>
    %71 = arith.divf %70, %69 : vector<1x1024xf32>
    %cst_30 = arith.constant 1.06140542 : f32
    %72 = vector.broadcast %cst_30 : f32 to vector<1x1024xf32>
    %73 = arith.mulf %71, %72 : vector<1x1024xf32>
    %cst_31 = arith.constant -1.45315206 : f32
    %74 = vector.broadcast %cst_31 : f32 to vector<1x1024xf32>
    %75 = arith.addf %74, %73 : vector<1x1024xf32>
    %76 = arith.mulf %71, %75 : vector<1x1024xf32>
    %cst_32 = arith.constant 1.42141378 : f32
    %77 = vector.broadcast %cst_32 : f32 to vector<1x1024xf32>
    %78 = arith.addf %77, %76 : vector<1x1024xf32>
    %79 = arith.mulf %71, %78 : vector<1x1024xf32>
    %cst_33 = arith.constant -0.284496725 : f32
    %80 = vector.broadcast %cst_33 : f32 to vector<1x1024xf32>
    %81 = arith.addf %80, %79 : vector<1x1024xf32>
    %82 = arith.mulf %71, %81 : vector<1x1024xf32>
    %cst_34 = arith.constant 0.254829586 : f32
    %83 = vector.broadcast %cst_34 : f32 to vector<1x1024xf32>
    %84 = arith.addf %83, %82 : vector<1x1024xf32>
    %85 = arith.mulf %71, %84 : vector<1x1024xf32>
    %cst_35 = arith.constant 0.000000e+00 : f32
    %86 = vector.broadcast %cst_35 : f32 to vector<1x1024xf32>
    %87 = arith.subf %86, %65 : vector<1x1024xf32>
    %88 = arith.mulf %87, %65 : vector<1x1024xf32>
    %89 = math.exp %88 : vector<1x1024xf32>
    %90 = arith.mulf %85, %89 : vector<1x1024xf32>
    %cst_36 = arith.constant 1.000000e+00 : f32
    %91 = vector.broadcast %cst_36 : f32 to vector<1x1024xf32>
    %92 = arith.subf %91, %90 : vector<1x1024xf32>
    %cst_37 = arith.constant 0.000000e+00 : f32
    %93 = vector.broadcast %cst_37 : f32 to vector<1x1024xf32>
    %94 = arith.cmpf oge, %64, %93 : vector<1x1024xf32>
    %cst_38 = arith.constant 0.000000e+00 : f32
    %95 = vector.broadcast %cst_38 : f32 to vector<1x1024xf32>
    %96 = arith.subf %95, %92 : vector<1x1024xf32>
    %97 = arith.select %94, %92, %96 : vector<1x1024xi1>, vector<1x1024xf32>
    %cst_39 = arith.constant 1.000000e+00 : f32
    %98 = vector.broadcast %cst_39 : f32 to vector<1x1024xf32>
    %99 = arith.addf %98, %97 : vector<1x1024xf32>
    %cst_40 = arith.constant 5.000000e-01 : f32
    %100 = vector.broadcast %cst_40 : f32 to vector<1x1024xf32>
    %101 = arith.mulf %100, %99 : vector<1x1024xf32>
    %102 = arith.mulf %1, %101 : vector<1x1024xf32>
    %103 = arith.subf %62, %102 : vector<1x1024xf32>
    %104 = arith.mulf %22, %103 : vector<1x1024xf32>
    %c0_41 = arith.constant 0 : index
    %c0_42 = arith.constant 0 : index
    %105 = vector.load %arg6[%c0_41, %c0_42] : memref<1x1024xf32, #tpu.memory_space<vmem>>, vector<1x1024xf32>
    tpu.vector_store %arg6[%c0_41, %c0_42], %104 {strides = array<i32>} : memref<1x1024xf32, #tpu.memory_space<vmem>>, vector<1x1024xf32>,
    return
  }
  func.func @transform_0(%arg0: i32) -> (i32, i32) {
    %c0_i32 = arith.constant 0 : i32
    %c0_i32_0 = arith.constant 0 : i32
    return %arg0, %c0_i32 : i32, i32
  }
  func.func @transform_1(%arg0: i32) -> (i32, i32) {
    %c0_i32 = arith.constant 0 : i32
    %c0_i32_0 = arith.constant 0 : i32
    return %arg0, %c0_i32 : i32, i32
  }
  func.func @transform_2(%arg0: i32) -> (i32, i32) {
    %c0_i32 = arith.constant 0 : i32
    %c0_i32_0 = arith.constant 0 : i32
    return %arg0, %c0_i32 : i32, i32
  }
  func.func @transform_3(%arg0: i32) -> (i32, i32) {
    %c0_i32 = arith.constant 0 : i32
    %c0_i32_0 = arith.constant 0 : i32
    return %arg0, %c0_i32 : i32, i32
  }
  func.func @transform_4(%arg0: i32) -> (i32, i32) {
    %c0_i32 = arith.constant 0 : i32
    %c0_i32_0 = arith.constant 0 : i32
    return %arg0, %c0_i32 : i32, i32
  }
  func.func @transform_5(%arg0: i32) -> (i32, i32) {
    %c0_i32 = arith.constant 0 : i32
    %c0_i32_0 = arith.constant 0 : i32
    return %arg0, %c0_i32 : i32, i32
  }
}

</mosaic_0001>

<bundles_post_ra>
// kernel: curran_asian_price.1
= control target key start
LH: loop header
LB: loop body
LE: loop exit
PB: predicated region body
PF: predicated region fallthrough
CT: control target
= control target key end

     0   :  { %10 = vsyncpa [#allocation3], 0  ;;  %s478_s0 = inlined_call_operand.hbm [shape: f32[1,1024], index: 0, kind: input, shape index: {}]   ;;  %s479_s1 = inlined_call_operand.hbm [shape: f32[1,1024], index: 1, kind: input, shape index: {}]   ;;  %s480_s2 = inlined_call_operand.hbm [shape: f32[1,1024], index: 2, kind: input, shape index: {}]   ;;  %s481_s3 = inlined_call_operand.hbm [shape: f32[1,1024], index: 3, kind: input, shape index: {}]   ;;  %s482_s4 = inlined_call_operand.vmem [shape: f32[1,1024], index: 4, kind: input, shape index: {}]   ;;  %s483_s5 = inlined_call_operand.hbm [shape: f32[1,1024], index: 5, kind: output, shape index: {}]  }
   0x1   :  { %11 = vsyncpa [#allocation6], 0 }
   0x2   :  { %12 = vsyncpa [#allocation9], 0  ;;  %s30_s20 = sshll.u32 %s479_s1, 4  ;;  %s31_s20 = int_to_ptr.hbm [resolvable:$true] %s30_s20 }
   0x3   :  { %13 = vsyncpa [#allocation4], 0  ;;  %s390_s21 = smov [#allocation5]   ;;  %s19_s25 = sshll.u32 %s478_s0, 4  ;;  %s20_s25 = int_to_ptr.hbm [resolvable:$true] %s19_s25 }
   0x4   :  { %s32_s22 = sshll.u32 %s390_s21, 4  ;;  %s391_s26 = smov [#allocation2]   ;;  %s33_s22 = int_to_ptr.vmem [resolvable:$true] %s32_s22 }
   0x5   :  { %35 = dma.hbm_to_vmem [thread:$0]  %s31_s20, 128, %s33_s22, [#allocation6]  }
   0x6   :  { %s21_s27 = sshll.u32 %s391_s26, 4  ;;  %s41_s30 = sshll.u32 %s480_s2, 4  ;;  %s22_s27 = int_to_ptr.vmem [resolvable:$true] %s21_s27  ;;  %s42_s30 = int_to_ptr.hbm [resolvable:$true] %s41_s30 }
   0x7   :  { %24 = dma.hbm_to_vmem [thread:$0]  %s20_s25, 128, %s22_s27, [#allocation3]  }
   0x8   :  { %s52_s7 = sshll.u32 %s481_s3, 4  ;;  %s392_s8 = smov [#allocation7]   ;;  %s53_s7 = int_to_ptr.hbm [resolvable:$true] %s52_s7 }
   0x9   :  { %s43_s9 = sshll.u32 %s392_s8, 4  ;;  %s393_s0 = smov [#allocation8]   ;;  %s44_s9 = int_to_ptr.vmem [resolvable:$true] %s43_s9 }
   0xa   :  { %46 = dma.hbm_to_vmem [thread:$0]  %s42_s30, 128, %s44_s9, [#allocation6]  }
   0xb   :  { %s54_s10 = sshll.u32 %s393_s0, 4  ;;  %s55_s10 = int_to_ptr.vmem [resolvable:$true] %s54_s10 }
   0xc   :  { %57 = dma.hbm_to_vmem [thread:$0]  %s53_s7, 128, %s55_s10, [#allocation9]  }
   0xd   :  { %382 = dma.done.wait [#allocation3], 128  }
   0xe   :  { %383 = vsyncadd [#allocation3], 4294967168 }
   0xf   :  { %384 = dma.done.wait [#allocation6], 256  }
  0x10   :  { %385 = vsyncadd [#allocation6], 4294967040 }
  0x11   :  { %386 = dma.done.wait [#allocation9], 128  }
  0x12   :  { %387 = vsyncadd [#allocation9], 4294967168  ;;  %v437_v0 = vld [vmem:[#allocation5] sm:$0xff]  ;;  %v439_v1 = vld [vmem:[#allocation7] sm:$0xff]  ;;  %s227_s14 = sshll.u32 %s483_s5, 4  ;;  %s228_s14 = int_to_ptr.hbm [resolvable:$true] %s227_s14 }
  0x13   :  { %244 = vrsqrt.f32 %v439_v1  ;;  %v106_v7 = vand.u32 2147483648, %v437_v0  ;;  %vm100_vm0 = vweird.f32 %v437_v0  ;;  %v104_v9 = vand.u32 2147483647, %v437_v0  ;;  %v79_v14 = vld [vmem:[#allocation8] sm:$0xff]  ;;  %v448_v16 = vld [vmem:[#allocation2] sm:$0xff] }
  0x14   :  { %246 = vrcp.f32 %v437_v0  ;;  %vm89_vm4 = vcmp.eq.f32.partialorder %v439_v1, inf  ;;  %v92_v18 = vand.u32 2147483648, %v439_v1  ;;  %v81_v20 = vmul.f32 0.4249183, %v79_v14  ;;  %v459_v29 = vld [vmem:[%s482_s4] sm:$0xff]  ;;  %s394_s4 = smov [#allocation10]  }
  0x15   :  { %v107_v13 = vor.u32 1.1754944e-38, %v106_v7  ;;  %vm105_vm3 = vcmp.eq.f32.partialorder %v104_v9, 8.507059e+37  ;;  %vm91_vm5 = vcmp.eq.f32.partialorder %v439_v1, 0.0  ;;  %s225_s11 = sshll.u32 %s394_s4, 4  ;;  %s226_s11 = int_to_ptr.vmem [resolvable:$true] %s225_s11 }
  0x16   :  { %v112_v25 = vmul.f32 0.5, %v81_v20 }
  0x18   :  { %v113_v28 = vmul.f32 %v112_v25, %v81_v20 }
  0x19   :  { %v245_v2 = vpop.eup %244 }
  0x1a   :  { %v247_v3 = vpop.eup %246  ;;  %v83_v4 = vmul.f32 %v245_v2, %v439_v1  ;;  %v114_v30 = vadd.f32 %v113_v28, %v459_v29 }
  0x1b   :  { %v96_v5 = vmul.f32 %v247_v3, %v437_v0  ;;  %vm101_vm1 = vweird.f32 %v247_v3 }
  0x1c   :  { %v84_v6 = vmul.f32 %v245_v2, %v83_v4  ;;  %vm102_vm2 = vmor %vm100_vm0, %vm101_vm1  ;;  %v115_v34 = vmul.f32 %v114_v30, %v439_v1 }
  0x1d   :  { %v97_v8 = vsub.f32 1.0, %v96_v5 }
  0x1e   :  { %v85_v10 = vmul.f32 0.5, %v84_v6 }
  0x1f   :  { %v98_v11 = vmul.f32 %v247_v3, %v97_v8 }
  0x20   :  { %v86_v12 = vsub.f32 1.5, %v85_v10 }
  0x21   :  { %v99_v15 = vadd.f32 %v247_v3, %v98_v11 }
  0x22   :  { %v87_v17 = vmul.f32 %v245_v2, %v86_v12 }
  0x23   :  { %v103_v19 = vsel %vm102_vm2, %v247_v3, %v99_v15 }
  0x24   :  { %v88_v21 = vmul.f32 %v87_v17, %v439_v1  ;;  %v108_v22 = vsel %vm105_vm3, %v107_v13, %v103_v19 }
  0x25   :  { %v109_v23 = vmul.f32 %v108_v22, %v448_v16 }
  0x26   :  { %v90_v24 = vsel %vm89_vm4, %v439_v1, %v88_v21 }
  0x27   :  { %v93_v26 = vsel %vm91_vm5, %v92_v18, %v90_v24  ;;  %248 = vlog2.f32 %v109_v23 }
  0x28   :  { %v94_v27 = vmul.f32 %v93_v26, %v81_v20 }
  0x2a   :  { %250 = vrcp.f32 %v94_v27  ;;  %vm122_vm6 = vweird.f32 %v94_v27  ;;  %v128_v35 = vand.u32 2147483648, %v94_v27  ;;  %v126_v38 = vand.u32 2147483647, %v94_v27 }
  0x2c   :  { %v129_v40 = vor.u32 1.1754944e-38, %v128_v35  ;;  %vm127_vm9 = vcmp.eq.f32.partialorder %v126_v38, 8.507059e+37 }
  0x2d   :  { %v249_v31 = vpop.eup %248 }
  0x2e   :  { %v111_v36 = vmul.f32 0.6931472, %v249_v31 }
  0x30   :  { %v251_v32 = vpop.eup %250  ;;  %v116_v41 = vadd.f32 %v115_v34, %v111_v36  ;;  %v133_v36 = vsub.f32 0.0, %v459_v29 }
  0x31   :  { %v118_v33 = vmul.f32 %v251_v32, %v94_v27  ;;  %vm123_vm7 = vweird.f32 %v251_v32 }
  0x32   :  { %vm124_vm8 = vmor %vm122_vm6, %vm123_vm7 }
  0x33   :  { %v119_v37 = vsub.f32 1.0, %v118_v33 }
  0x35   :  { %v120_v39 = vmul.f32 %v251_v32, %v119_v37 }
  0x37   :  { %v121_v42 = vadd.f32 %v251_v32, %v120_v39 }
  0x39   :  { %v125_v43 = vsel %vm124_vm8, %v251_v32, %v121_v42  ;;  %v134_v42 = vmul.f32 %v133_v36, %v439_v1 }
  0x3a   :  { %v130_v44 = vsel %vm127_vm9, %v129_v40, %v125_v43 }
  0x3b   :  { %v131_v45 = vmul.f32 %v130_v44, %v116_v41 }
  0x3d   :  { %v132_v46 = vsub.f32 %v131_v45, %v94_v27  ;;  %v463_v47 = vmul.f32 0.70710677, %v131_v45 }
  0x3f   :  { %v138_v48 = vand.u32 2147483647, %v463_v47  ;;  %v466_v49 = vmul.f32 0.70710677, %v132_v46  ;;  %vm171_vm2 = vcmp.ge.f32.partialorder %v463_v47, 0.0 }
  0x41   :  { %v139_v50 = vmul.f32 0.3275911, %v138_v48  ;;  %v178_v51 = vand.u32 2147483647, %v466_v49  ;;  %v165_v6 = vsub.f32 0.0, %v138_v48  ;;  %vm211_vm3 = vcmp.ge.f32.partialorder %v466_v49, 0.0 }
  0x43   :  { %v140_v52 = vadd.f32 1.0, %v139_v50  ;;  %v179_v53 = vmul.f32 0.3275911, %v178_v51  ;;  %v166_v13 = vmul.f32 %v165_v6, %v138_v48  ;;  %v205_v14 = vsub.f32 0.0, %v178_v51 }
  0x44   :  { %v135_v48 = vmul.f32 1.442695, %v134_v42 }
  0x45   :  { %252 = vrcp.f32 %v140_v52  ;;  %v180_v54 = vadd.f32 1.0, %v179_v53  ;;  %v150_v57 = vand.u32 2147483647, %v140_v52  ;;  %v152_v58 = vand.u32 2147483648, %v140_v52 }
  0x46   :  { %vm146_vm10 = vweird.f32 %v140_v52  ;;  %v167_v21 = vmul.f32 1.442695, %v166_v13  ;;  %v206_v22 = vmul.f32 %v205_v14, %v178_v51 }
  0x47   :  { %254 = vrcp.f32 %v180_v54  ;;  %vm151_vm13 = vcmp.eq.f32.partialorder %v150_v57, 8.507059e+37  ;;  %v153_v63 = vor.u32 1.1754944e-38, %v152_v58  ;;  %vm186_vm14 = vweird.f32 %v180_v54 }
  0x48   :  { %v192_v2 = vand.u32 2147483648, %v180_v54  ;;  %v190_v5 = vand.u32 2147483647, %v180_v54  ;;  %256 = vpow2.f32 %v167_v21  ;;  %v207_v27 = vmul.f32 1.442695, %v206_v22 }
  0x4a   :  { %v193_v10 = vor.u32 1.1754944e-38, %v192_v2  ;;  %vm191_vm1 = vcmp.eq.f32.partialorder %v190_v5, 8.507059e+37  ;;  %258 = vpow2.f32 %v207_v27 }
  0x4b   :  { %v253_v55 = vpop.eup %252  ;;  %260 = vpow2.f32 %v135_v48 }
  0x4c   :  { %v142_v56 = vmul.f32 %v253_v55, %v140_v52  ;;  %vm147_vm11 = vweird.f32 %v253_v55 }
  0x4d   :  { %v255_v60 = vpop.eup %254  ;;  %vm148_vm12 = vmor %vm146_vm10, %vm147_vm11 }
  0x4e   :  { %v143_v59 = vsub.f32 1.0, %v142_v56  ;;  %v182_v62 = vmul.f32 %v255_v60, %v180_v54  ;;  %vm187_vm15 = vweird.f32 %v255_v60  ;;  %v257_v35 = vpop.eup %256 }
  0x4f   :  { %vm188_vm0 = vmor %vm186_vm14, %vm187_vm15 }
  0x50   :  { %v144_v61 = vmul.f32 %v253_v55, %v143_v59  ;;  %v183_v4 = vsub.f32 1.0, %v182_v62  ;;  %v259_v41 = vpop.eup %258 }
  0x51   :  { %v261_v58 = vpop.eup %260 }
  0x52   :  { %v145_v3 = vadd.f32 %v253_v55, %v144_v61  ;;  %v184_v8 = vmul.f32 %v255_v60, %v183_v4 }
  0x54   :  { %v149_v7 = vsel %vm148_vm12, %v253_v55, %v145_v3  ;;  %v185_v12 = vadd.f32 %v255_v60, %v184_v8 }
  0x55   :  { %v154_v9 = vsel %vm151_vm13, %v153_v63, %v149_v7 }
  0x56   :  { %v156_v11 = vmul.f32 1.0614054, %v154_v9  ;;  %v189_v17 = vsel %vm188_vm0, %v255_v60, %v185_v12 }
  0x57   :  { %v194_v18 = vsel %vm191_vm1, %v193_v10, %v189_v17 }
  0x58   :  { %v157_v15 = vadd.f32 -1.4531521, %v156_v11  ;;  %v196_v20 = vmul.f32 1.0614054, %v194_v18 }
  0x5a   :  { %v158_v19 = vmul.f32 %v157_v15, %v154_v9  ;;  %v197_v24 = vadd.f32 -1.4531521, %v196_v20 }
  0x5c   :  { %v159_v23 = vadd.f32 1.4214138, %v158_v19  ;;  %v198_v26 = vmul.f32 %v197_v24, %v194_v18 }
  0x5e   :  { %v160_v25 = vmul.f32 %v159_v23, %v154_v9  ;;  %v199_v30 = vadd.f32 1.4214138, %v198_v26 }
  0x60   :  { %v161_v28 = vadd.f32 -0.28449672, %v160_v25  ;;  %v200_v32 = vmul.f32 %v199_v30, %v194_v18 }
  0x62   :  { %v162_v31 = vmul.f32 %v161_v28, %v154_v9  ;;  %v201_v34 = vadd.f32 -0.28449672, %v200_v32 }
  0x64   :  { %v163_v33 = vadd.f32 0.2548296, %v162_v31  ;;  %v202_v38 = vmul.f32 %v201_v34, %v194_v18 }
  0x66   :  { %v164_v37 = vmul.f32 %v163_v33, %v154_v9  ;;  %v203_v40 = vadd.f32 0.2548296, %v202_v38 }
  0x68   :  { %v169_v39 = vmul.f32 %v257_v35, %v164_v37  ;;  %v204_v44 = vmul.f32 %v203_v40, %v194_v18 }
  0x6a   :  { %v170_v43 = vsub.f32 1.0, %v169_v39  ;;  %v209_v46 = vmul.f32 %v259_v41, %v204_v44 }
  0x6c   :  { %v172_v45 = vsub.f32 0.0, %v170_v43  ;;  %v210_v51 = vsub.f32 1.0, %v209_v46 }
  0x6e   :  { %v173_v50 = vsel %vm171_vm2, %v170_v43, %v172_v45  ;;  %v212_v29 = vsub.f32 0.0, %v210_v51 }
  0x6f   :  { %v174_v52 = vadd.f32 1.0, %v173_v50 }
  0x70   :  { %v213_v54 = vsel %vm211_vm3, %v210_v51, %v212_v29 }
  0x71   :  { %v175_v53 = vmul.f32 0.5, %v174_v52  ;;  %v214_v55 = vadd.f32 1.0, %v213_v54 }
  0x73   :  { %v176_v56 = vmul.f32 %v175_v53, %v448_v16  ;;  %v215_v1 = vmul.f32 0.5, %v214_v55 }
  0x75   :  { %v216_v57 = vmul.f32 %v215_v1, %v437_v0 }
  0x77   :  { %v217_v47 = vsub.f32 %v176_v56, %v216_v57 }
  0x79   :  { %v218_v59 = vmul.f32 %v261_v58, %v217_v47 }
  0x7b   :  { %219 = vst [vmem:[#allocation10] sm:$0xff] %v218_v59 }
  0x7c   :  { %230 = dma.vmem_to_hbm [thread:$0]  %s226_s11, 128, %s228_s14, [#allocation4]  }
  0x7d   :  { %388 = dma.done.wait [#allocation4], 128  }
  0x7e   :  { %389 = vsyncadd [#allocation4], 4294967168 }
  0x7f   :  { %235 = vsyncpa [#allocation3], 1 }
  0x80   :  { %236 = vsyncpa [#allocation6], 1 }
  0x81   :  { %237 = vsyncpa [#allocation9], 1 }
  0x82   :  { %238 = vsyncpa [#allocation4], 1 }

</bundles_post_ra>
